<compile_context>
chip_gen: v7x
topology: tpu7x:2x2x1
jax: 0.10.0
libtpu: 0.0.40
codegen_flags: <defaults>
</compile_context>

<pallas_src>
import functools

import jax
import jax.numpy as jnp
from jax import lax
from jax.experimental import pallas as pl
from jax.experimental.pallas import tpu as pltpu

ALPHA = 0.25
GAMMA = 2.0

_FLAT_LANES = (512, 256, 128)           # lane-dense widths tried for the free reshape
_TARGET_BLOCK_BYTES = 2 * 1024 * 1024   # per-input HBM->VMEM block (DMA granularity)
_TARGET_SUB_BYTES = 128 * 1024          # f32 elementwise temporaries per compute chunk


def _sublane_align(dtype):
    return {4: 8, 2: 16, 1: 32}.get(jnp.dtype(dtype).itemsize, 8)


def _auto_sizes(rows, cols, itemsize, align, target_block_bytes, target_sub_bytes):
    """Pick (block_rows, sub_rows): block = DMA tile, sub = compute granule."""
    if rows < align:
        return rows, rows                       # single full-extent block (legal)
    max_aligned = (rows // align) * align
    sub = max(align, (target_sub_bytes // (cols * 4)) // align * align)
    sub = min(sub, max_aligned)
    per_sub = sub * cols * itemsize
    k = max(1, target_block_bytes // per_sub)
    block = min(sub * k, (rows // sub) * sub)
    return block, sub


def _focal_loss_kernel(
    x_ref, t_ref, out_ref, acc_ref, *,
    alpha, gamma, soft_targets, rows, cols, block_rows, sub_rows, acc_rows,
    n_blocks, blocks_per_part, has_tail, has_overhang,
):
    p = pl.program_id(0)                  # part (TensorCore shard when num_parts > 1)
    j = pl.program_id(1)                  # row-block within the part (reduction axis)

    @pl.when(j == 0)
    def _init():
        acc_ref[...] = jnp.zeros_like(acc_ref)

    blk = p * blocks_per_part + j         # logical (unclamped) row-block index
    n_sub = block_rows // sub_rows
    tail_valid = rows - (n_blocks - 1) * block_rows   # valid rows in trailing block

    def accumulate(x, t, row0, masked):
        x = x.astype(jnp.float32)
        t = t.astype(jnp.float32)
        e = jnp.exp(-jnp.abs(x))                                   # EUP
        # Numerically stable BCE-with-logits (matches torch, reduction='none').
        bce = jnp.maximum(x, 0.0) - x * t + jnp.log1p(e)
        if soft_targets:
            # Literal module semantics (pt = exp(-bce)) for arbitrary soft labels.
            pt = jnp.exp(-bce)
        else:
            # Hard {0,1} targets: pt == exp(-bce) exactly; computed from exp(-|x|)
            # with an approx EUP reciprocal (+1 Newton step) instead of a 3rd exp.
            d = 1.0 + e
            r = pl.reciprocal(d, approx=True)
            r = r * (2.0 - d * r)                                  # Newton refine
            prob = jnp.where(x >= 0.0, 1.0, e) * r                 # sigmoid(x)
            pt = t * prob + (1.0 - t) * (1.0 - prob)
        u = 1.0 - pt
        if gamma == 2.0:                  # trace-time specialization (keeps EUP free)
            w = u * u
        elif gamma == 1.0:
            w = u
        elif gamma == 0.0:
            w = jnp.ones_like(u)
        else:
            w = jnp.power(u, gamma)
        focal = (alpha * w) * bce
        if masked:                        # only the trailing block pays iota/compare/select
            ridx = row0 + lax.broadcasted_iota(jnp.int32, focal.shape, 0)
            focal = jnp.where(ridx < tail_valid, focal, 0.0)
        if acc_rows == 8:
            # (sub, cols) -> (sub//8, 8, cols); axis-0 sum = pure VALU vreg adds.
            contrib = focal.reshape(sub_rows // 8, 8, cols).sum(axis=0)
        else:
            contrib = focal.sum(axis=0, keepdims=True)
        acc_ref[...] += contrib

    def accumulate_block(masked):
        if n_sub == 1:
            accumulate(x_ref[...], t_ref[...], 0, masked)
        else:
            def body(i, carry):
                r0 = i * sub_rows
                if not isinstance(r0, int):
                    r0 = pl.multiple_of(r0, sub_rows)
                accumulate(x_ref[pl.ds(r0, sub_rows), :],
                           t_ref[pl.ds(r0, sub_rows), :], r0, masked)
                return carry
            lax.fori_loop(0, n_sub, body, 0, unroll=True)

    n_full = n_blocks - 1 if has_tail else n_blocks
    if has_tail or has_overhang:
        @pl.when(blk < n_full)
        def _interior():
            accumulate_block(masked=False)

        if has_tail:
            @pl.when(blk == n_blocks - 1)
            def _tail():
                accumulate_block(masked=True)
    else:
        accumulate_block(masked=False)

    @pl.when(j == pl.num_programs(1) - 1)
    def _finalize():
        out_ref[...] = acc_ref[...][None]


def focal_loss(
    inputs, targets, *,
    alpha=ALPHA, gamma=GAMMA, reduction="mean", soft_targets=False,
    num_parts=1, target_block_bytes=_TARGET_BLOCK_BYTES,
    target_sub_bytes=_TARGET_SUB_BYTES, block_rows=None, sub_rows=None,
):
    assert inputs.shape == targets.shape and inputs.size > 0
    total = inputs.size
    x_item = jnp.dtype(inputs.dtype).itemsize
    t_item = jnp.dtype(targets.dtype).itemsize

    # Lane-dense view: free row-major reshape whenever N*C divides a 128-multiple.
    lanes = next((l for l in _FLAT_LANES if total % l == 0), None)
    if lanes is not None:
        x2 = inputs.reshape(total // lanes, lanes)
        t2 = targets.reshape(total // lanes, lanes)
    else:
        last = inputs.shape[-1] if inputs.ndim > 1 else total
        x2 = inputs.reshape(-1, last)
        t2 = targets.reshape(-1, last)
        # TODO(synk): add lane-axis (column) blocking for extremely wide trailing
        # dims not divisible by 128; the fallback keeps the full last dim per block.
    rows, cols = x2.shape

    align = max(_sublane_align(inputs.dtype), _sublane_align(targets.dtype))
    auto_block, auto_sub = _auto_sizes(rows, cols, max(x_item, t_item), align,
                                       target_block_bytes, target_sub_bytes)
    if rows < align:
        block_rows, sub_rows = rows, rows       # single full-extent block
    else:
        if sub_rows is None:
            sub_rows = auto_sub if block_rows is None else min(auto_sub, block_rows)
        if block_rows is None:
            block_rows = max(sub_rows, (auto_block // sub_rows) * sub_rows)
        assert sub_rows % align == 0 and sub_rows <= rows
        assert block_rows % sub_rows == 0 and block_rows <= rows
    acc_rows = 8 if sub_rows % 8 == 0 else 1

    n_blocks = (rows + block_rows - 1) // block_rows
    has_tail = (rows % block_rows) != 0
    num_parts = max(1, min(int(num_parts), n_blocks))
    blocks_per_part = (n_blocks + num_parts - 1) // num_parts
    has_overhang = num_parts * blocks_per_part != n_blocks

    if has_overhang:
        def row_block(p, j):
            return (jnp.minimum(p * blocks_per_part + j, n_blocks - 1), 0)
    else:
        def row_block(p, j):
            return (p * blocks_per_part + j, 0)

    kernel = functools.partial(
        _focal_loss_kernel,
        alpha=float(alpha), gamma=float(gamma), soft_targets=bool(soft_targets),
        rows=rows, cols=cols, block_rows=block_rows, sub_rows=sub_rows,
        acc_rows=acc_rows, n_blocks=n_blocks, blocks_per_part=blocks_per_part,
        has_tail=has_tail, has_overhang=has_overhang,
    )

    # VMEM budget: 2 inputs x 2 pipeline buffers + f32 chunk temporaries + acc/out.
    need = (2 * block_rows * cols * (x_item + t_item)
            + 8 * sub_rows * cols * 4
            + 3 * acc_rows * cols * 4
            + (2 << 20))
    vmem_limit = int(min(max(need, 8 << 20), 100 << 20))

    cost = pl.CostEstimate(
        flops=int(14 * total),
        transcendentals=int((3 if soft_targets else 2) * total),
        bytes_accessed=int(total * (x_item + t_item) + num_parts * acc_rows * cols * 4),
    )

    partials = pl.pallas_call(
        kernel,
        out_shape=jax.ShapeDtypeStruct((num_parts, acc_rows, cols), jnp.float32),
        grid_spec=pltpu.PrefetchScalarGridSpec(
            num_scalar_prefetch=0,
            grid=(num_parts, blocks_per_part),
            in_specs=[
                pl.BlockSpec((block_rows, cols), row_block),
                pl.BlockSpec((block_rows, cols), row_block),
            ],
            out_specs=pl.BlockSpec((1, acc_rows, cols), lambda p, j: (p, 0, 0)),
            scratch_shapes=[pltpu.VMEM((acc_rows, cols), jnp.float32)],
        ),
        # TODO(synk): on v7x, confirm (xprof) the leading "parallel" axis really
        # shards across both TensorCores; otherwise switch to pltpu.CORE_PARALLEL
        # or pl.core_map with per-core partial sums.
        compiler_params=pltpu.CompilerParams(
            dimension_semantics=("parallel", "arbitrary"),
            vmem_limit_bytes=vmem_limit,
        ),
        cost_estimate=cost,
    )(x2, t2)

    total_sum = jnp.sum(partials)
    if reduction == "mean":
        return total_sum / total
    return total_sum  # reduction == 'sum'


def focal_loss_ref(inputs, targets, *, alpha=ALPHA, gamma=GAMMA, reduction="mean"):
    x = inputs.astype(jnp.float32)
    t = targets.astype(jnp.float32)
    bce = jnp.maximum(x, 0.0) - x * t + jnp.log1p(jnp.exp(-jnp.abs(x)))
    pt = jnp.exp(-bce)
    focal = alpha * (1.0 - pt) ** gamma * bce
    return jnp.mean(focal) if reduction == "mean" else jnp.sum(focal)


if __name__ == "__main__":
    key = jax.random.PRNGKey(0)

    configs = [
        # (shape, dtype, soft_targets, num_parts, block_rows, sub_rows)
        ((33, 128), jnp.float32, False, 2, 8, 8),        # multi-block + ragged tail + 2 parts
        ((50, 256), jnp.float32, False, 1, None, None),  # lane-dense flatten (25x512) + tail
        ((8, 128), jnp.float32, False, 1, None, None),   # tiny single full-extent block
        ((10, 5), jnp.float32, False, 1, None, None),    # non-flattenable small-C fallback
        ((64, 128), jnp.bfloat16, False, 1, None, None), # bf16 inputs (16-row alignment)
        ((25, 64), jnp.float32, True, 1, None, None),    # soft targets: exact exp(-bce) path
    ]

    for shape, dtype, soft, parts, br, sr in configs:
        key, k1, k2 = jax.random.split(key, 3)
        logits = (jax.random.normal(k1, shape, dtype=jnp.float32) * 2.0).astype(dtype)
        if soft:
            targets = jax.random.uniform(k2, shape, dtype=jnp.float32)
        else:
            targets = jax.random.bernoulli(k2, 0.5, shape).astype(dtype)

        loss = focal_loss(logits, targets, soft_targets=soft, num_parts=parts,
                          block_rows=br, sub_rows=sr)
        jax.block_until_ready(loss)
        ref = focal_loss_ref(logits, targets)
        assert jnp.allclose(loss, ref, rtol=5e-4, atol=1e-6), (
            shape, str(dtype), float(loss), float(ref))

    # reduction='sum' path
    key, k1, k2 = jax.random.split(key, 3)
    logits = jax.random.normal(k1, (10, 5), dtype=jnp.float32)
    targets = jax.random.bernoulli(k2, 0.5, (10, 5)).astype(jnp.float32)
    loss_sum = focal_loss(logits, targets, reduction="sum")
    jax.block_until_ready(loss_sum)
    ref_sum = focal_loss_ref(logits, targets, reduction="sum")
    assert jnp.allclose(loss_sum, ref_sum, rtol=5e-4, atol=1e-6)

    print("KERNEL_OK")
</pallas_src>

<mosaic_0001>
module attributes {stable_mosaic.version = 11 : i64} {
  func.func @_focal_loss_kernel(%arg0: i32, %arg1: i32, %arg2: memref<8x128xf32, #tpu.memory_space<vmem>>, %arg3: memref<8x128xf32, #tpu.memory_space<vmem>>, %arg4: memref<1x8x128xf32, #tpu.memory_space<vmem>>, %arg5: memref<8x128xf32, #tpu.memory_space<vmem>>) attributes {dimension_semantics = [#tpu.dimension_semantics<parallel>, #tpu.dimension_semantics<arbitrary>], iteration_bounds = array<i64: 2, 3>, scalar_prefetch = 0 : i64, scratch_operands = 1 : i64, tpu.core_type = #tpu.core_type<tc>, window_params = [{transform_indices = @transform_0, window_bounds = array<i64: 8, 128>}, {transform_indices = @transform_1, window_bounds = array<i64: 8, 128>}, {transform_indices = @transform_2, window_bounds = array<i64: 1, 8, 128>}]} {
    %c0_i32 = arith.constant 0 : i32
    %0 = arith.cmpi eq, %arg1, %c0_i32 : i32
    %1 = arith.extui %0 : i1 to i32
    %c0_i32_0 = arith.constant 0 : i32
    %2 = arith.cmpi ne, %1, %c0_i32_0 : i32
    scf.if %2 {
      %cst = arith.constant 0.000000e+00 : f32
      %14 = vector.broadcast %cst : f32 to vector<8x128xf32>
      %c0 = arith.constant 0 : index
      %c0_5 = arith.constant 0 : index
      %15 = vector.load %arg5[%c0, %c0_5] : memref<8x128xf32, #tpu.memory_space<vmem>>, vector<8x128xf32>
      tpu.vector_store %arg5[%c0, %c0_5], %14 {strides = array<i32>} : memref<8x128xf32, #tpu.memory_space<vmem>>, vector<8x128xf32>,
    } else {
    }
    %c3_i32 = arith.constant 3 : i32
    %3 = arith.muli %arg0, %c3_i32 : i32
    %4 = arith.addi %3, %arg1 : i32
    %c4_i32 = arith.constant 4 : i32
    %5 = arith.cmpi slt, %4, %c4_i32 : i32
    %6 = arith.extui %5 : i1 to i32
    %c0_i32_1 = arith.constant 0 : i32
    %7 = arith.cmpi ne, %6, %c0_i32_1 : i32
    scf.if %7 {
      %c0 = arith.constant 0 : index
      %c0_5 = arith.constant 0 : index
      %14 = vector.load %arg2[%c0, %c0_5] : memref<8x128xf32, #tpu.memory_space<vmem>>, vector<8x128xf32>
      %c0_6 = arith.constant 0 : index
      %c0_7 = arith.constant 0 : index
      %15 = vector.load %arg3[%c0_6, %c0_7] : memref<8x128xf32, #tpu.memory_space<vmem>>, vector<8x128xf32>
      %16 = math.absf %14 : vector<8x128xf32>
      %cst = arith.constant 0.000000e+00 : f32
      %17 = vector.broadcast %cst : f32 to vector<8x128xf32>
      %18 = arith.subf %17, %16 : vector<8x128xf32>
      %19 = math.exp %18 : vector<8x128xf32>
      %cst_8 = arith.constant 0.000000e+00 : f32
      %20 = vector.broadcast %cst_8 : f32 to vector<8x128xf32>
      %21 = arith.maximumf %14, %20 : vector<8x128xf32>
      %22 = arith.mulf %14, %15 : vector<8x128xf32>
      %23 = arith.subf %21, %22 : vector<8x128xf32>
      %24 = math.log1p %19 : vector<8x128xf32>
      %25 = arith.addf %23, %24 : vector<8x128xf32>
      %cst_9 = arith.constant 1.000000e+00 : f32
      %26 = vector.broadcast %cst_9 : f32 to vector<8x128xf32>
      %27 = arith.addf %26, %19 : vector<8x128xf32>
      %28 = tpu.reciprocal %27 {approx = true} : vector<8x128xf32> -> vector<8x128xf32>
      %29 = arith.mulf %27, %28 : vector<8x128xf32>
      %cst_10 = arith.constant 2.000000e+00 : f32
      %30 = vector.broadcast %cst_10 : f32 to vector<8x128xf32>
      %31 = arith.subf %30, %29 : vector<8x128xf32>
      %32 = arith.mulf %28, %31 : vector<8x128xf32>
      %cst_11 = arith.constant 0.000000e+00 : f32
      %33 = vector.broadcast %cst_11 : f32 to vector<8x128xf32>
      %34 = arith.cmpf oge, %14, %33 : vector<8x128xf32>
      %cst_12 = arith.constant 1.000000e+00 : f32
      %35 = vector.broadcast %cst_12 : f32 to vector<8x128xf32>
      %36 = arith.select %34, %35, %19 : vector<8x128xi1>, vector<8x128xf32>
      %37 = arith.mulf %36, %32 : vector<8x128xf32>
      %38 = arith.mulf %15, %37 : vector<8x128xf32>
      %cst_13 = arith.constant 1.000000e+00 : f32
      %39 = vector.broadcast %cst_13 : f32 to vector<8x128xf32>
      %40 = arith.subf %39, %15 : vector<8x128xf32>
      %cst_14 = arith.constant 1.000000e+00 : f32
      %41 = vector.broadcast %cst_14 : f32 to vector<8x128xf32>
      %42 = arith.subf %41, %37 : vector<8x128xf32>
      %43 = arith.mulf %40, %42 : vector<8x128xf32>
      %44 = arith.addf %38, %43 : vector<8x128xf32>
      %cst_15 = arith.constant 1.000000e+00 : f32
      %45 = vector.broadcast %cst_15 : f32 to vector<8x128xf32>
      %46 = arith.subf %45, %44 : vector<8x128xf32>
      %47 = arith.mulf %46, %46 : vector<8x128xf32>
      %cst_16 = arith.constant 2.500000e-01 : f32
      %48 = vector.broadcast %cst_16 : f32 to vector<8x128xf32>
      %49 = arith.mulf %48, %47 : vector<8x128xf32>
      %50 = arith.mulf %49, %25 : vector<8x128xf32>
      %51 = vector.shape_cast %50 : vector<8x128xf32> to vector<1x8x128xf32>
      %cst_17 = arith.constant dense<0.000000e+00> : vector<8x128xf32>
      %52 = vector.multi_reduction <add>, %51, %cst_17 [0] : vector<1x8x128xf32> to vector<8x128xf32>
      %c0_18 = arith.constant 0 : index
      %c0_19 = arith.constant 0 : index
      %53 = vector.load %arg5[%c0_18, %c0_19] : memref<8x128xf32, #tpu.memory_space<vmem>>, vector<8x128xf32>
      %54 = arith.addf %53, %52 : vector<8x128xf32>
      %c0_20 = arith.constant 0 : index
      %c0_21 = arith.constant 0 : index
      %55 = vector.load %arg5[%c0_20, %c0_21] : memref<8x128xf32, #tpu.memory_space<vmem>>, vector<8x128xf32>
      tpu.vector_store %arg5[%c0_20, %c0_21], %54 {strides = array<i32>} : memref<8x128xf32, #tpu.memory_space<vmem>>, vector<8x128xf32>,
    } else {
    }
    %c4_i32_2 = arith.constant 4 : i32
    %8 = arith.cmpi eq, %4, %c4_i32_2 : i32
    %9 = arith.extui %8 : i1 to i32
    %c0_i32_3 = arith.constant 0 : i32
    %10 = arith.cmpi ne, %9, %c0_i32_3 : i32
    scf.if %10 {
      %c0 = arith.constant 0 : index
      %c0_5 = arith.constant 0 : index
      %14 = vector.load %arg2[%c0, %c0_5] : memref<8x128xf32, #tpu.memory_space<vmem>>, vector<8x128xf32>
      %c0_6 = arith.constant 0 : index
      %c0_7 = arith.constant 0 : index
      %15 = vector.load %arg3[%c0_6, %c0_7] : memref<8x128xf32, #tpu.memory_space<vmem>>, vector<8x128xf32>
      %16 = math.absf %14 : vector<8x128xf32>
      %cst = arith.constant 0.000000e+00 : f32
      %17 = vector.broadcast %cst : f32 to vector<8x128xf32>
      %18 = arith.subf %17, %16 : vector<8x128xf32>
      %19 = math.exp %18 : vector<8x128xf32>
      %cst_8 = arith.constant 0.000000e+00 : f32
      %20 = vector.broadcast %cst_8 : f32 to vector<8x128xf32>
      %21 = arith.maximumf %14, %20 : vector<8x128xf32>
      %22 = arith.mulf %14, %15 : vector<8x128xf32>
      %23 = arith.subf %21, %22 : vector<8x128xf32>
      %24 = math.log1p %19 : vector<8x128xf32>
      %25 = arith.addf %23, %24 : vector<8x128xf32>
      %cst_9 = arith.constant 1.000000e+00 : f32
      %26 = vector.broadcast %cst_9 : f32 to vector<8x128xf32>
      %27 = arith.addf %26, %19 : vector<8x128xf32>
      %28 = tpu.reciprocal %27 {approx = true} : vector<8x128xf32> -> vector<8x128xf32>
      %29 = arith.mulf %27, %28 : vector<8x128xf32>
      %cst_10 = arith.constant 2.000000e+00 : f32
      %30 = vector.broadcast %cst_10 : f32 to vector<8x128xf32>
      %31 = arith.subf %30, %29 : vector<8x128xf32>
      %32 = arith.mulf %28, %31 : vector<8x128xf32>
      %cst_11 = arith.constant 0.000000e+00 : f32
      %33 = vector.broadcast %cst_11 : f32 to vector<8x128xf32>
      %34 = arith.cmpf oge, %14, %33 : vector<8x128xf32>
      %cst_12 = arith.constant 1.000000e+00 : f32
      %35 = vector.broadcast %cst_12 : f32 to vector<8x128xf32>
      %36 = arith.select %34, %35, %19 : vector<8x128xi1>, vector<8x128xf32>
      %37 = arith.mulf %36, %32 : vector<8x128xf32>
      %38 = arith.mulf %15, %37 : vector<8x128xf32>
      %cst_13 = arith.constant 1.000000e+00 : f32
      %39 = vector.broadcast %cst_13 : f32 to vector<8x128xf32>
      %40 = arith.subf %39, %15 : vector<8x128xf32>
      %cst_14 = arith.constant 1.000000e+00 : f32
      %41 = vector.broadcast %cst_14 : f32 to vector<8x128xf32>
      %42 = arith.subf %41, %37 : vector<8x128xf32>
      %43 = arith.mulf %40, %42 : vector<8x128xf32>
      %44 = arith.addf %38, %43 : vector<8x128xf32>
      %cst_15 = arith.constant 1.000000e+00 : f32
      %45 = vector.broadcast %cst_15 : f32 to vector<8x128xf32>
      %46 = arith.subf %45, %44 : vector<8x128xf32>
      %47 = arith.mulf %46, %46 : vector<8x128xf32>
      %cst_16 = arith.constant 2.500000e-01 : f32
      %48 = vector.broadcast %cst_16 : f32 to vector<8x128xf32>
      %49 = arith.mulf %48, %47 : vector<8x128xf32>
      %50 = arith.mulf %49, %25 : vector<8x128xf32>
      %51 = tpu.iota {dimensions = array<i32: 0>} : vector<8x128xi32>
      %c0_i32_17 = arith.constant 0 : i32
      %52 = vector.broadcast %c0_i32_17 : i32 to vector<8x128xi32>
      %53 = arith.addi %52, %51 : vector<8x128xi32>
      %c1_i32 = arith.constant 1 : i32
      %54 = vector.broadcast %c1_i32 : i32 to vector<8x128xi32>
      %55 = arith.cmpi slt, %53, %54 : vector<8x128xi32>
      %cst_18 = arith.constant 0.000000e+00 : f32
      %56 = vector.broadcast %cst_18 : f32 to vector<8x128xf32>
      %57 = arith.select %55, %50, %56 : vector<8x128xi1>, vector<8x128xf32>
      %58 = vector.shape_cast %57 : vector<8x128xf32> to vector<1x8x128xf32>
      %cst_19 = arith.constant dense<0.000000e+00> : vector<8x128xf32>
      %59 = vector.multi_reduction <add>, %58, %cst_19 [0] : vector<1x8x128xf32> to vector<8x128xf32>
      %c0_20 = arith.constant 0 : index
      %c0_21 = arith.constant 0 : index
      %60 = vector.load %arg5[%c0_20, %c0_21] : memref<8x128xf32, #tpu.memory_space<vmem>>, vector<8x128xf32>
      %61 = arith.addf %60, %59 : vector<8x128xf32>
      %c0_22 = arith.constant 0 : index
      %c0_23 = arith.constant 0 : index
      %62 = vector.load %arg5[%c0_22, %c0_23] : memref<8x128xf32, #tpu.memory_space<vmem>>, vector<8x128xf32>
      tpu.vector_store %arg5[%c0_22, %c0_23], %61 {strides = array<i32>} : memref<8x128xf32, #tpu.memory_space<vmem>>, vector<8x128xf32>,
    } else {
    }
    %c2_i32 = arith.constant 2 : i32
    %11 = arith.cmpi eq, %arg1, %c2_i32 : i32
    %12 = arith.extui %11 : i1 to i32
    %c0_i32_4 = arith.constant 0 : i32
    %13 = arith.cmpi ne, %12, %c0_i32_4 : i32
    scf.if %13 {
      %c0 = arith.constant 0 : index
      %c0_5 = arith.constant 0 : index
      %14 = vector.load %arg5[%c0, %c0_5] : memref<8x128xf32, #tpu.memory_space<vmem>>, vector<8x128xf32>
      %15 = vector.shape_cast %14 : vector<8x128xf32> to vector<1x8x128xf32>
      %c0_6 = arith.constant 0 : index
      %c0_7 = arith.constant 0 : index
      %c0_8 = arith.constant 0 : index
      %16 = vector.load %arg4[%c0_6, %c0_7, %c0_8] : memref<1x8x128xf32, #tpu.memory_space<vmem>>, vector<1x8x128xf32>
      tpu.vector_store %arg4[%c0_6, %c0_7, %c0_8], %15 {strides = array<i32>} : memref<1x8x128xf32, #tpu.memory_space<vmem>>, vector<1x8x128xf32>,
    } else {
    }
    return
  }
  func.func @transform_0(%arg0: i32, %arg1: i32) -> (i32, i32) {
    %c3_i32 = arith.constant 3 : i32
    %0 = arith.muli %arg0, %c3_i32 : i32
    %1 = arith.addi %0, %arg1 : i32
    %c4_i32 = arith.constant 4 : i32
    %2 = arith.minsi %1, %c4_i32 : i32
    %c0_i32 = arith.constant 0 : i32
    %c0_i32_0 = arith.constant 0 : i32
    return %2, %c0_i32 : i32, i32
  }
  func.func @transform_1(%arg0: i32, %arg1: i32) -> (i32, i32) {
    %c3_i32 = arith.constant 3 : i32
    %0 = arith.muli %arg0, %c3_i32 : i32
    %1 = arith.addi %0, %arg1 : i32
    %c4_i32 = arith.constant 4 : i32
    %2 = arith.minsi %1, %c4_i32 : i32
    %c0_i32 = arith.constant 0 : i32
    %c0_i32_0 = arith.constant 0 : i32
    return %2, %c0_i32 : i32, i32
  }
  func.func @transform_2(%arg0: i32, %arg1: i32) -> (i32, i32, i32) {
    %c0_i32 = arith.constant 0 : i32
    %c0_i32_0 = arith.constant 0 : i32
    %c0_i32_1 = arith.constant 0 : i32
    return %arg0, %c0_i32, %c0_i32_0 : i32, i32, i32
  }
}

</mosaic_0001>

<bundles_post_ra>
// kernel: tpu_custom_call.1
= control target key start
LH: loop header
LB: loop body
LE: loop exit
PB: predicated region body
PF: predicated region fallthrough
CT: control target
= control target key end

     0   :  { %s1107_s0 = inlined_call_operand.hbm [shape: f32[33,128], index: 0, kind: input, shape index: {}]   ;;  %s1108_s1 = inlined_call_operand.hbm [shape: f32[33,128], index: 1, kind: input, shape index: {}]   ;;  %s1109_s2 = inlined_call_operand.hbm [shape: f32[2,8,128], index: 2, kind: output, shape index: {}]  }
   0x1   :  { %1116 = sst [smem:[#allocation14_spill]] %s1107_s0 }
   0x2   :  { %7 = vsyncpa [#allocation4], 0 }
   0x3   :  { %9 = vsyncpa [#allocation4 + $0x1], 0 }
   0x4   :  { %10 = vsyncpa [#allocation7], 0 }
   0x5   :  { %12 = vsyncpa [#allocation7 + $0x1], 0 }
   0x6   :  { %13 = vsyncpa [#allocation5], 0 }
   0x7   :  { %15 = vsyncpa [#allocation5 + $0x1], 0  ;;  %s810_s9 = smov 0   ;;  %s812_s10 = smov 0  }
   0x8   :  { %s814_s11 = smov 0   ;;  %s816_s12 = smov 0  }
   0x9   :  { %s818_s13 = smov 0   ;;  %s820_s14 = smov 0  }
   0xa   :  { %s822_s15 = smov 0   ;;  %s824_s16 = smov 0  }
   0xb   :  { %s826_s17 = smov 0   ;;  %s828_s18 = smov 0  }
   0xc   :  { %s830_s19 = smov 0  }
   0xd LB: > { %s463_s20 = sadd.s32 4294967295, %s789_s19   ;;  %s464_s21 = sadd.s32 4294967294, %s789_s19   ;;  %s789_s19 = sphi %s830_s19, %s21_s19   ;;  %s785_s18 = sphi %s828_s18, %s1145_s18   ;;  %s781_s17 = sphi %s826_s17, %s1144_s17   ;;  %s777_s16 = sphi %s824_s16, %s1143_s16   ;;  %s773_s15 = sphi %s822_s15, %s1142_s15   ;;  %s769_s14 = sphi %s820_s14, %s1141_s14   ;;  %s765_s13 = sphi %s818_s13, %s1140_s13   ;;  %s761_s12 = sphi %s816_s12, %s1139_s12   ;;  %s757_s11 = sphi %s814_s11, %s1138_s11   ;;  %s753_s10 = sphi %s812_s10, %s1137_s10   ;;  %s749_s9 = sphi %s810_s9, %s1136_s9  }
   0xe   : > { %s30_s22 = sadd.s32 1, %s781_s17  ;;  %s33_s23 = sadd.s32 1, %s785_s18 }
   0xf   : > { %p31_p0 = scmp.ge.s32.totalorder %s30_s22, 3  ;;  %s37_s24 = smul.u32 3, %s785_s18 }
  0x10   : > { %s48_s25 = sadd.s32 1, %s769_s14  ;;  %p55_p1 = scmp.ne.s32.totalorder %s769_s14, %s765_s13 }
  0x11   : > { %s1147_s22 = smov (%p31_p0, %s30_s22), 0  ;;  %s1149_s23 = smov (!%p31_p0, %s33_s23), %s785_s18 }
  0x12   : > { %1117 = sst [smem:[#allocation12_spill]] %s1147_s22  ;;  %s38_s26 = sadd.s32 %s781_s17, %s37_s24 }
  0x13   : > { %p56_p2 = scmp.eq.s32.totalorder %s789_s19, 0  ;;  %p35_p3 = scmp.ge.s32.totalorder %s1149_s23, 2 }
  0x14   : > { %p39_p4 = scmp.lt.s32.totalorder %s38_s26, 4  ;;  %p61_p6 = scmp.ne.s32.totalorder %s765_s13, %s761_s12 }
  0x15   : > { %p878_p5 = por %p56_p2, %p55_p1  ;;  %s1151_s23 = smov (%p35_p3, %s1149_s23), 0 }
  0x16   : > { %1119 = sst [smem:[#allocation13_spill]] %s1151_s23  ;;  %s1153_s26 = smov (!%p39_p4, %s38_s26), 4 }
  0x17   : > { %s41_s28 = smul.u32 3, %s1151_s23  ;;  %p62_p7 = scmp.eq.s32.totalorder %s463_s20, 0 }
  0x18   : > { %s105_s29 = ssub.s32 %s785_s18, %s1151_s23  ;;  %s108_s30 = sadd.s32 1, %s757_s11 }
  0x19   : > { %s42_s3 = sadd.s32 %s41_s28, %s1147_s22  ;;  %p893_p8 = por %p62_p7, %p61_p6 }
  0x1a   : > { %p43_p9 = scmp.lt.s32.totalorder %s42_s3, 4  ;;  %p106_p10 = scmp.eq.s32.totalorder %s105_s29, 0 }
  0x1b   : > { %s1120_s4 = scalar_select %p893_p8, 1, 0 }
  0x1c   : > { %p118_p11 = scmp.ne.s32.totalorder %s757_s11, %s753_s10  ;;  %p119_p12 = scmp.eq.s32.totalorder %s463_s20, 5 }
  0x1d   : > { %s1155_s3 = smov (!%p43_p9, %s42_s3), 4  ;;  %p124_p1 = scmp.ne.s32.totalorder %s753_s10, %s749_s9 }
  0x1e   : > { %s900_s5 = scalar_select %p106_p10, %s757_s11, %s108_s30  }
  0x1f   : > { %s45_s6 = ssub.s32 %s1153_s26, %s1155_s3  ;;  %p903_p13 = por %p119_p12, %p118_p11 }
  0x20   : > { %p46_p0 = scmp.eq.s32.totalorder %s45_s6, 0  ;;  %p125_p2 = scmp.eq.s32.totalorder %s464_s21, 5 }
  0x21   : > { %s1121_s7 = scalar_select %p903_p13, 1, 0 }
  0x22   : > { %s914_s8 = scalar_select %p46_p0, %s769_s14, %s48_s25  }
  0x23   : > { %p916_p3 = por %p125_p2, %p124_p1  ;;  %p500_p4 = scmp.lt.s32.totalorder %s789_s19, 6 }
  0x24   : > { %s922_s20 = sand.u32 1, %s769_s14   ;;  %s1111_s24 = sshll.u32 %s1153_s26, 7 }
  0x25   : > { %s1122_s12 = scalar_select %p916_p3, 1, 0 }
  0x26   : > { %s1110_s28 = sshll.u32 %s922_s20, 3  ;;  %s1123_s0 = sld [smem:[#allocation14_spill]] }
  0x27   : > { %s149_s25 = scalar_lea.vmem [#allocation3], %s1110_s28  ;;  %p937_p6 = pnand %p500_p4, %p878_p5 }
  0x28   : > { %s160_s3 = sshll.u32 %s149_s25, 4  ;;  %s146_s29 = scalar_lea.sflag [#allocation4], %s922_s20  ;;  %s941_s3 = int_to_ptr.vmem [resolvable:$true] %s160_s3 }
  0x29   : > { %p605_p11 = pneg %p937_p6 }
  0x2c   : > { %s931_s21 = scalar_lea.hbm %s1123_s0, %s1111_s24  ;;  %s608_s28 = scalar_lea.hbm %s1123_s0, 640 }
  0x2d   : > { %s603_s30 = scalar_lea.hbm %s931_s21, 128  ;;  %p609_p5 = scmp.lt.u32.totalorder %s931_s21, %s1123_s0 }
  0x2e   : > { %p604_p10 = scmp.ne.s32.totalorder %s931_s21, %s603_s30  ;;  %p610_p1 = scmp.lt.u32.totalorder %s608_s28, %s603_s30 }
  0x2f   : > { %p612_p4 = scmp.lt.u32.totalorder %s603_s30, %s931_s21 }
  0x30   : > { %p606_p12 = pnand %p605_p11, %p604_p10  ;;  %p611_p2 = por %p610_p1, %p609_p5 }
  0x32   : > { %p607_p0 = pneg %p606_p12  ;;  %p613_p7 = por %p612_p4, %p611_p2 }
  0x34   : > { %p614_p9 = pnand %p613_p7, %p607_p0 }
  0x36   : > { %617 = shalt.err (!%p614_p9)
}
  0x37   : > { %s618_s22 = scalar_lea.vmem %s941_s3, 128  ;;  %s791_s27 = smov [#allocation3]  }
  0x38   : > { %p619_p10 = scmp.ne.s32.totalorder %s941_s3, %s618_s22  ;;  %s623_s25 = sshll.u32 %s791_s27, 4  ;;  %s624_s25 = int_to_ptr.vmem [resolvable:$false] %s623_s25 }
  0x39   : > { %s625_s23 = scalar_lea.vmem %s624_s25, 256  ;;  %p626_p13 = scmp.lt.s32.totalorder %s941_s3, %s624_s25 }
  0x3a   : > { %p621_p12 = pnand %p619_p10, %p605_p11  ;;  %p627_p5 = scmp.lt.s32.totalorder %s625_s23, %s618_s22 }
  0x3c   : > { %p622_p3 = pneg %p621_p12  ;;  %p628_p1 = por %p627_p5, %p626_p13 }
  0x3e   : > { %p629_p2 = pnand %p628_p1, %p622_p3 }
  0x40   : > { %632 = shalt.err (!%p629_p2)
}
  0x41   : > { %492 = dma.hbm_to_vmem [thread:$0]  (!%p937_p6), %s931_s21, 128, %s941_s3, %s146_s29  }
  0x42   : > { %p1125_p7 = scmp.lt.s32.totalorder %s789_s19, 7  ;;  %p1126_p9 = scmp.ge.s32.totalorder %s789_s19, 1 }
  0x43   : > { %s1128_s22 = sshll.u32 %s1153_s26, 7  ;;  %s1129_s25 = sshll.u32 %s922_s20, 3 }
  0x44   : > { %p975_p0 = pnand %p1126_p9, %p1125_p7  ;;  %s984_s27 = scalar_lea.hbm %s1108_s1, %s1128_s22 }
  0x45   : > { %s171_s23 = scalar_lea.vmem [#allocation6], %s1129_s25  ;;  %s168_s21 = scalar_lea.sflag [#allocation7], %s922_s20 }
  0x46   : > { %s1127_s24 = scalar_select %p975_p0, 1, 0 }
  0x47   : > { %s182_s0 = sshll.u32 %s171_s23, 4  ;;  %s633_s3 = scalar_lea.hbm %s984_s27, 128  ;;  %s183_s0 = int_to_ptr.vmem [resolvable:$true] %s182_s0 }
  0x48   : > { %p634_p13 = scmp.ne.s32.totalorder %s984_s27, %s633_s3  ;;  %s638_s22 = scalar_lea.hbm %s1108_s1, 640 }
  0x49   : > { %p639_p10 = scmp.lt.u32.totalorder %s984_s27, %s1108_s1  ;;  %p640_p12 = scmp.lt.u32.totalorder %s638_s22, %s633_s3 }
  0x4a   : > { %p636_p3 = pnand %p634_p13, %p605_p11  ;;  %p642_p1 = scmp.lt.u32.totalorder %s633_s3, %s984_s27 }
  0x4b   : > { %p641_p5 = por %p640_p12, %p639_p10 }
  0x4c   : > { %p637_p4 = pneg %p636_p3 }
  0x4d   : > { %p643_p2 = por %p642_p1, %p641_p5 }
  0x4f   : > { %p644_p7 = pnand %p643_p2, %p637_p4 }
  0x51   : > { %647 = shalt.err (!%p644_p7)
}
  0x52   : > { %s648_s20 = scalar_lea.vmem %s183_s0, 128  ;;  %s792_s25 = smov [#allocation6]  }
  0x53   : > { %p649_p9 = scmp.ne.s32.totalorder %s183_s0, %s648_s20  ;;  %s653_s23 = sshll.u32 %s792_s25, 4  ;;  %s654_s23 = int_to_ptr.vmem [resolvable:$false] %s653_s23 }
  0x54   : > { %s655_s26 = scalar_lea.vmem %s654_s23, 256  ;;  %p656_p8 = scmp.lt.s32.totalorder %s183_s0, %s654_s23 }
  0x55   : > { %p651_p13 = pnand %p649_p9, %p605_p11  ;;  %p657_p0 = scmp.lt.s32.totalorder %s655_s26, %s648_s20 }
  0x57   : > { %p652_p3 = pneg %p651_p13  ;;  %p658_p10 = por %p657_p0, %p656_p8 }
  0x59   : > { %p659_p12 = pnand %p658_p10, %p652_p3 }
  0x5b   : > { %662 = shalt.err (!%p659_p12)
}
  0x5c   : > { %495 = dma.hbm_to_vmem [thread:$0]  (!%p937_p6), %s984_s27, 128, %s183_s0, %s168_s21  }
  0x5d   : > { %p1130_p4 = scmp.ne.s32.totalorder %s1127_s24, 0 }
  0x5e   : > { %s193_s3 = sand.u32 (!%p1130_p4), 1, %s765_s13   ;;  %p1131_p11 = scmp.ne.s32.totalorder (!%p1130_p4), %s1120_s4, 0 }
  0x5f   : > { %191 = sbr.rel (%p1130_p4) target bundleno = 266 (0x10a), region = 28  ;;  %s472_s29 = sshll.u32 (!%p1130_p4), %s193_s3, 3 }
  0x60   : > { %s194_s22 = scalar_lea.sflag (!%p1130_p4), [#allocation4], %s193_s3  ;;  %s1011_s28 = scalar_lea.vmem (!%p1130_p4), [#allocation3], %s472_s29 }
  0x66   : > { %736 = dma.done.wait (%p1131_p11), %s194_s22, 128  }
  0x67   : > { %738 = vsyncadd (%p1131_p11), %s194_s22, 4294967168  ;;  %s203_s30 = scalar_lea.sflag [#allocation7], %s193_s3  ;;  %s1017_s6 = scalar_lea.vmem [#allocation6], %s472_s29 }
  0x68   : > { %740 = dma.done.wait (%p1131_p11), %s203_s30, 128  }
  0x69   : > { %742 = vsyncadd (%p1131_p11), %s203_s30, 4294967168  ;;  %s229_s0 = sand.u32 1, %s753_s10   ;;  %p475_p8 = scmp.ne.s32.totalorder %s773_s15, 0 }
  0x6a   : > { %s1026_s24 = sshll.u32 %s229_s0, 3  ;;  %v793_v0 = vmov (!%p475_p8), 0.0  }
  0x6b   : > { %s231_s27 = scalar_lea.vmem [#allocation8], %s1026_s24  ;;  %243 = sbr.rel (%p475_p8) target bundleno = 114 (0x72), region = 40  ;;  %244 = vst [vmem:[#allocation2] sm:$0xff] (!%p475_p8), %v793_v0 }
  0x72 PF: > { %s245_s21 = smul.u32 3, %s777_s16 }
  0x74   : > { %s1032_s20 = sadd.s32 %s773_s15, %s245_s21 }
  0x75   : > { %p476_p6 = scmp.ge.s32.totalorder %s1032_s20, 4 }
  0x76   : > { %v251_v1 = vld [vmem:[%s1011_s28] sm:$0xff] (!%p476_p6)  ;;  %v252_v11 = vld [vmem:[%s1017_s6] sm:$0xff] (!%p476_p6) }
  0x77   : > { %250 = sbr.rel (%p476_p6) target bundleno = 174 (0xae), region = 44  ;;  %v253_v2 = vand.u32 (!%p476_p6), 2147483647, %v251_v1  ;;  %vm275_vm0 = vcmp.ge.f32.partialorder (!%p476_p6), %v251_v1, 0.0  ;;  %v279_v18 = vsub.f32 (!%p476_p6), 1.0, %v252_v11  ;;  %v257_v19 = vmax.f32 (!%p476_p6), %v251_v1, 0.0 }
  0x78   : > { %v258_v20 = vmul.f32 (!%p476_p6), %v252_v11, %v251_v1  ;;  %v288_v33 = vld [vmem:[#allocation2] sm:$0xff] (!%p476_p6) }
  0x79   : > { %v254_v3 = vsub.f32 (!%p476_p6), 0.0, %v253_v2 }
  0x7a   : > { %v259_v26 = vsub.f32 (!%p476_p6), %v257_v19, %v258_v20 }
  0x7b   : > { %v255_v4 = vmul.f32 (!%p476_p6), 1.442695, %v254_v3 }
  0x7d   : > { %591 = vpow2.f32 (!%p476_p6), %v255_v4 }
  0x87   : > { %v592_v5 = vpop.eup %591 }
  0x88   : > { %v260_v6 = vadd.f32 1.0, %v592_v5  ;;  %v263_v9 = vmul.f32 -0.5, %v592_v5  ;;  %v276_v12 = vsel %vm275_vm0, 1.0, %v592_v5  ;;  %v266_v16 = vand.u32 2147483647, %v592_v5 }
  0x8a   : > { %593 = vrcp.f32 %v260_v6  ;;  %v264_v14 = vadd.f32 1.0, %v263_v9  ;;  %vm267_vm1 = vcmp.lt.f32.partialorder %v266_v16, 0.0004427343 }
  0x8b   : > { %595 = vlog2.f32 %v260_v6 }
  0x8c   : > { %v265_v24 = vmul.f32 %v592_v5, %v264_v14 }
  0x94   : > { %v594_v7 = vpop.eup %593 }
  0x95   : > { %v272_v8 = vmul.f32 %v594_v7, %v260_v6  ;;  %v596_v15 = vpop.eup %595 }
  0x96   : > { %v262_v23 = vmul.f32 0.6931472, %v596_v15 }
  0x97   : > { %v273_v10 = vsub.f32 2.0, %v272_v8 }
  0x98   : > { %v268_v28 = vsel %vm267_vm1, %v265_v24, %v262_v23 }
  0x99   : > { %v274_v13 = vmul.f32 %v594_v7, %v273_v10  ;;  %v269_v30 = vadd.f32 %v268_v28, %v259_v26 }
  0x9b   : > { %v277_v17 = vmul.f32 %v276_v12, %v274_v13 }
  0x9d   : > { %v278_v21 = vmul.f32 %v277_v17, %v252_v11  ;;  %v280_v22 = vsub.f32 1.0, %v277_v17 }
  0x9f   : > { %v281_v25 = vmul.f32 %v280_v22, %v279_v18 }
  0xa1   : > { %v282_v27 = vadd.f32 %v281_v25, %v278_v21 }
  0xa3   : > { %v283_v29 = vsub.f32 1.0, %v282_v27 }
  0xa5   : > { %v284_v31 = vmul.f32 %v283_v29, %v283_v29 }
  0xa7   : > { %v285_v32 = vmul.f32 0.25, %v284_v31 }
  0xa9   : > { %v286_v34 = vmul.f32 %v285_v32, %v269_v30 }
  0xab   : > { %v289_v35 = vadd.f32 %v288_v33, %v286_v34 }
  0xad   : > { %290 = vst [vmem:[#allocation2] sm:$0xff] %v289_v35 }
  0xae PF: > { %p477_p0 = scmp.ne.s32.totalorder %s1032_s20, 4 }
  0xaf   : > { %v295_v36 = vld [vmem:[%s1011_s28] sm:$0xff] (!%p477_p0)  ;;  %v296_v46 = vld [vmem:[%s1017_s6] sm:$0xff] (!%p477_p0)  ;;  %v331_v61 = vlaneseq (!%p477_p0) }
  0xb0   : > { %294 = sbr.rel (%p477_p0) target bundleno = 232 (0xe8), region = 48  ;;  %v297_v37 = vand.u32 (!%p477_p0), 2147483647, %v295_v36  ;;  %vm319_vm2 = vcmp.ge.f32.partialorder (!%p477_p0), %v295_v36, 0.0  ;;  %v323_v53 = vsub.f32 (!%p477_p0), 1.0, %v296_v46  ;;  %v301_v54 = vmax.f32 (!%p477_p0), %v295_v36, 0.0 }
  0xb1   : > { %v302_v55 = vmul.f32 (!%p477_p0), %v296_v46, %v295_v36  ;;  %v332_v2 = vshrl.u32 (!%p477_p0), %v331_v61, 7 }
  0xb2   : > { %v298_v38 = vsub.f32 (!%p477_p0), 0.0, %v297_v37 }
  0xb3   : > { %v303_v62 = vsub.f32 (!%p477_p0), %v301_v54, %v302_v55  ;;  %vm333_vm4 = vcmp.lt.s32.totalorder (!%p477_p0), %v332_v2, 1 }
  0xb4   : > { %v299_v39 = vmul.f32 (!%p477_p0), 1.442695, %v298_v38  ;;  %v336_v7 = vld [vmem:[#allocation2] sm:$0xff] (!%p477_p0) }
  0xb6   : > { %597 = vpow2.f32 (!%p477_p0), %v299_v39 }
  0xc0   : > { %v598_v40 = vpop.eup %597 }
  0xc1   : > { %v304_v41 = vadd.f32 1.0, %v598_v40  ;;  %v307_v44 = vmul.f32 -0.5, %v598_v40  ;;  %v320_v47 = vsel %vm319_vm2, 1.0, %v598_v40  ;;  %v310_v51 = vand.u32 2147483647, %v598_v40 }
  0xc3   : > { %599 = vrcp.f32 %v304_v41  ;;  %v308_v49 = vadd.f32 1.0, %v307_v44  ;;  %vm311_vm3 = vcmp.lt.f32.partialorder %v310_v51, 0.0004427343 }
  0xc4   : > { %601 = vlog2.f32 %v304_v41 }
  0xc5   : > { %v309_v59 = vmul.f32 %v598_v40, %v308_v49 }
  0xcd   : > { %v600_v42 = vpop.eup %599 }
  0xce   : > { %v316_v43 = vmul.f32 %v600_v42, %v304_v41  ;;  %v602_v50 = vpop.eup %601 }
  0xcf   : > { %v306_v58 = vmul.f32 0.6931472, %v602_v50 }
  0xd0   : > { %v317_v45 = vsub.f32 2.0, %v316_v43 }
  0xd1   : > { %v312_v0 = vsel %vm311_vm3, %v309_v59, %v306_v58 }
  0xd2   : > { %v318_v48 = vmul.f32 %v600_v42, %v317_v45  ;;  %v313_v3 = vadd.f32 %v312_v0, %v303_v62 }
  0xd4   : > { %v321_v52 = vmul.f32 %v320_v47, %v318_v48 }
  0xd6   : > { %v322_v56 = vmul.f32 %v321_v52, %v296_v46  ;;  %v324_v57 = vsub.f32 1.0, %v321_v52 }
  0xd8   : > { %v325_v60 = vmul.f32 %v324_v57, %v323_v53 }
  0xda   : > { %v326_v63 = vadd.f32 %v325_v60, %v322_v56 }
  0xdc   : > { %v327_v1 = vsub.f32 1.0, %v326_v63 }
  0xde   : > { %v328_v4 = vmul.f32 %v327_v1, %v327_v1 }
  0xe0   : > { %v329_v5 = vmul.f32 0.25, %v328_v4 }
  0xe2   : > { %v330_v6 = vmul.f32 %v329_v5, %v313_v3 }
  0xe4   : > { %v334_v8 = vsel %vm333_vm4, %v330_v6, 0.0 }
  0xe5   : > { %v337_v9 = vadd.f32 %v336_v7, %v334_v8 }
  0xe7   : > { %338 = vst [vmem:[#allocation2] sm:$0xff] %v337_v9 }
  0xe8 PF: > { %p478_p5 = scmp.ne.s32.totalorder %s773_s15, 2 }
  0xea   : > { %342 = sbr.rel (%p478_p5) target bundleno = 241 (0xf1), region = 52 }
  0xee   : > { %v343_v10 = vld [vmem:[#allocation2] sm:$0xff] (!%p478_p5) }
  0xef   : > { %344 = vst [vmem:[%s231_s27] sm:$0xff] (!%p478_p5), %v343_v10 }
  0xf1 PF: > { %s480_s4 = sshll.u32 %s777_s16, 7  ;;  %s359_s3 = sshll.u32 %s231_s27, 4  ;;  %s360_s3 = int_to_ptr.vmem [resolvable:$true] %s359_s3 }
  0xf2   : > { %s1047_s26 = scalar_lea.hbm %s1109_s2, %s480_s4  ;;  %s346_s15 = scalar_lea.sflag [#allocation5], %s229_s0 }
  0xf3   : > { %s663_s29 = scalar_lea.vmem %s360_s3, 128  ;;  %p1132_p2 = scmp.ne.s32.totalorder %s1121_s7, 0 }
  0xf4   : > { %p664_p1 = scmp.ne.s32.totalorder %s360_s3, %s663_s29  ;;  %s794_s22 = smov [#allocation8]  }
  0xf5   : > { %s667_s28 = sshll.u32 %s794_s22, 4  ;;  %s668_s28 = int_to_ptr.vmem [resolvable:$false] %s667_s28 }
  0xf6   : > { %p665_p7 = pnand %p664_p1, %p1132_p2  ;;  %s669_s30 = scalar_lea.vmem %s668_s28, 256 }
  0xf7   : > { %p670_p13 = scmp.lt.s32.totalorder %s360_s3, %s668_s28  ;;  %p671_p3 = scmp.lt.s32.totalorder %s669_s30, %s663_s29 }
  0xf8   : > { %p666_p9 = pneg %p665_p7 }
  0xf9   : > { %p672_p10 = por %p671_p3, %p670_p13 }
  0xfb   : > { %p673_p12 = pnand %p672_p10, %p666_p9 }
  0xfd   : > { %676 = shalt.err (!%p673_p12)
}
  0xfe   : > { %s677_s16 = scalar_lea.hbm %s1047_s26, 128  ;;  %s681_s24 = scalar_lea.hbm %s1109_s2, 256 }
  0xff   : > { %p678_p4 = scmp.ne.s32.totalorder %s1047_s26, %s677_s16  ;;  %p682_p6 = scmp.lt.u32.totalorder %s1047_s26, %s1109_s2 }
 0x100   : > { %p683_p0 = scmp.lt.u32.totalorder %s681_s24, %s677_s16  ;;  %p685_p1 = scmp.lt.u32.totalorder %s677_s16, %s1047_s26 }
 0x101   : > { %p679_p11 = pnand %p678_p4, %p1132_p2 }
 0x102   : > { %p684_p5 = por %p683_p0, %p682_p6 }
 0x103   : > { %p680_p8 = pneg %p679_p11 }
 0x104   : > { %p686_p7 = por %p685_p1, %p684_p5 }
 0x106   : > { %p687_p9 = pnand %p686_p7, %p680_p8 }
 0x108   : > { %690 = shalt.err (!%p687_p9)
}
 0x109   : > { %487 = dma.vmem_to_hbm [thread:$0]  (%p1132_p2), %s360_s3, 128, %s1047_s26, %s346_s15  }
 0x10a PF: > { %p501_p13 = scmp.ge.s32.totalorder %s789_s19, 2  ;;  %s371_s20 = sand.u32 1, %s749_s9  }
 0x10b   : > { %p1133_p3 = scmp.ne.s32.totalorder %s1122_s12, 0  ;;  %s372_s4 = scalar_lea.sflag [#allocation5], %s371_s20 }
 0x10d   : > { %p497_p10 = pnand %p501_p13, %p1133_p3 }
 0x10f   : > { %744 = dma.done.wait (!%p497_p10), %s372_s4, 128  }
 0x110   : > { %746 = vsyncadd (!%p497_p10), %s372_s4, 4294967168  ;;  %s21_s19 = sadd.s32 1, %s789_s19   ;;  %s1134_s7 = sld [smem:[#allocation12_spill]] }
 0x111   : > { %p18_p12 = scmp.ge.s32.totalorder %s21_s19, 8   ;;  %s1135_s25 = sld [smem:[#allocation13_spill]] }
 0x112   : > { %s1136_s9 = smov %s753_s10  ;;  %s1137_s10 = smov %s757_s11 }
 0x113   : > { %s1138_s11 = smov %s900_s5  ;;  %s1139_s12 = smov %s765_s13 }
 0x114   : > { %s1140_s13 = smov %s769_s14  ;;  %s1141_s14 = smov %s914_s8 }
 0x115   : > { %s1142_s15 = smov %s781_s17  ;;  %s1143_s16 = smov %s785_s18 }
 0x116   : > { %s1144_s17 = smov %s1134_s7  ;;  %20 = sbr.rel (!%p18_p12) target bundleno = 13 (0xd), region = 102 }
 0x117   : > { %s1145_s18 = smov %s1135_s25 }
 0x11d   :  { %377 = vsyncpa [#allocation4], 1 }
 0x11e   :  { %379 = vsyncpa [#allocation4 + $0x1], 1 }
 0x11f   :  { %380 = vsyncpa [#allocation7], 1 }
 0x120   :  { %382 = vsyncpa [#allocation7 + $0x1], 1 }
 0x121   :  { %383 = vsyncpa [#allocation5], 1 }
 0x122   :  { %385 = vsyncpa [#allocation5 + $0x1], 1 }

</bundles_post_ra>
